<compile_context>
chip_gen: v6e
topology: v6e:2x2x1
jax: 0.10.0
libtpu: 0.0.40
codegen_flags: <defaults>
</compile_context>

<pallas_src>
import jax
import jax.numpy as jnp
from jax.experimental import pallas as pl
from jax.experimental.pallas import tpu as pltpu

EPS = 1e-5  # PyTorch nn.LayerNorm default eps


def _prenorm_linear_kernel(x_ref, w_ref, b_ref, o_ref, y_ref):
    """Grid (i, j): row tile i, output-column slab j.

    j == 0 : LayerNorm the (TM, D) row tile with f32 statistics and cache the
             normalized activations (bf16) in VMEM scratch (reused for all j).
    every j: MXU matmul (bf16 x bf16 -> f32 accumulate) against the
             affine-folded weight slab, then f32 bias add and store.
    """

    @pl.when(pl.program_id(1) == 0)
    def _():
        x = x_ref[...].astype(jnp.float32)                          # (TM, D)
        inv_d = jnp.float32(1.0 / x.shape[-1])
        mean = jnp.sum(x, axis=-1, keepdims=True) * inv_d           # (TM, 1)
        xc = x - mean
        # two-pass variance (biased, matching PyTorch); kept for numerics --
        # the reductions are hidden under DMA in this mem-bound kernel.
        var = jnp.sum(xc * xc, axis=-1, keepdims=True) * inv_d
        y_ref[...] = (xc * jax.lax.rsqrt(var + EPS)).astype(jnp.bfloat16)

    out = jnp.dot(y_ref[...], w_ref[...],
                  preferred_element_type=jnp.float32)               # (TM, TN)
    o_ref[...] = (out + b_ref[...]).astype(o_ref.dtype)


def _ceil_to(n, m):
    return ((n + m - 1) // m) * m


def _pick_tm(rows, tm_max, align, min_tiles=8):
    """Row tile: aligned, prefers dividing `rows` (no pad), and small enough
    that there are ~min_tiles row tiles to feed 2 TCs / the DMA pipeline."""
    cap = max(align, (rows // max(min_tiles, 1)) // align * align)
    hi = max(align, min(tm_max - tm_max % align if tm_max >= align else align,
                        cap,
                        rows - rows % align if rows >= align else align))
    for tm in range(hi, align - 1, -align):
        if rows % tm == 0:
            return tm, rows                   # exact divisor -> no padding
    return hi, _ceil_to(rows, hi)             # fall back to padded rows


def _pick_tn(d, h_p, tm, vmem_budget=24 * 1024 * 1024):
    """Column slab: full (padded) H when the bf16 weight fits VMEM, else the
    largest 256- (or 128-) multiple dividing H that fits."""

    def fits(tn):
        w_b = 2 * d * tn * 2          # double-buffered bf16 weight slab
        x_b = 2 * tm * d * 4          # double-buffered x tile (f32 worst case)
        y_b = tm * d * 2              # bf16 normalized scratch
        o_b = 2 * tm * tn * 4         # double-buffered output tile (f32 worst case)
        b_b = 2 * tn * 4
        return (w_b + x_b + y_b + o_b + b_b) < vmem_budget

    if fits(h_p):
        return h_p                    # weight fully resident
    for step in (256, 128):           # prefer 256-wide slabs (v6e/v7x MXU)
        tn = (h_p // step) * step
        while tn >= step:
            if h_p % tn == 0 and fits(tn):
                return tn
            tn -= step
    return 128


def prenorm_fn(x, gamma, beta, w, b, *, tm=256, out_dtype=None):
    """PreNorm: fn(LayerNorm(x)) with fn = Linear(D -> H).

    x:     (B, S, D)
    gamma: (1, D), beta: (1, D)   -- nn.LayerNorm affine params
    w:     (D, H)                 -- NOTE: transposed vs PyTorch Linear's (H, D)
    b:     (1, H)
    out_dtype: output dtype (default x.dtype; pass bf16 to halve writeback)
    returns (B, S, H)
    """
    B, S, D = x.shape
    if w.shape[0] != D:
        raise ValueError(f"w must be (D, H)=({D}, H); got {w.shape} "
                         "(did you forget to transpose PyTorch's (H, D) weight?)")
    H = w.shape[1]
    out_dtype = x.dtype if out_dtype is None else out_dtype

    # ---- fold the LayerNorm affine into the Linear (exact, f32 precompute) ----
    gamma_f = gamma.reshape(D).astype(jnp.float32)
    beta_f = beta.reshape(D).astype(jnp.float32)
    w_f = w.astype(jnp.float32)
    w_fold = gamma_f[:, None] * w_f                         # (D, H)
    b_fold = (beta_f @ w_f + b.reshape(H).astype(jnp.float32))[None, :]  # (1, H) f32

    # ---- pad H to a multiple of 128 for lane-dense (unmasked) stores ----
    H_p = _ceil_to(H, 128)
    if H_p != H:
        w_fold = jnp.pad(w_fold, ((0, 0), (0, H_p - H)))
        b_fold = jnp.pad(b_fold, ((0, 0), (0, H_p - H)))
    w_bf = w_fold.astype(jnp.bfloat16)                      # halve weight HBM bytes

    # ---- row tiling ----
    rows = B * S
    row_align = 16 if x.dtype == jnp.bfloat16 else 8        # bf16 packs 16 sublanes
    tm, rows_p = _pick_tm(rows, tm, row_align)
    x2 = x.reshape(rows, D)
    if rows_p != rows:
        # zero rows -> finite LayerNorm output (rsqrt(eps)); sliced off below.
        x2 = jnp.pad(x2, ((0, rows_p - rows), (0, 0)))

    tn = _pick_tn(D, H_p, tm)
    grid = (rows_p // tm, H_p // tn)

    out2 = pl.pallas_call(
        _prenorm_linear_kernel,
        out_shape=jax.ShapeDtypeStruct((rows_p, H_p), out_dtype),
        grid_spec=pltpu.PrefetchScalarGridSpec(
            num_scalar_prefetch=0,
            grid=grid,
            in_specs=[
                pl.BlockSpec((tm, D), lambda i, j: (i, 0)),   # x rows (stream on i)
                pl.BlockSpec((D, tn), lambda i, j: (0, j)),   # folded bf16 weight slab
                pl.BlockSpec((1, tn), lambda i, j: (0, j)),   # folded f32 bias slab
            ],
            out_specs=pl.BlockSpec((tm, tn), lambda i, j: (i, j)),  # lane-dense store
            scratch_shapes=[pltpu.VMEM((tm, D), jnp.bfloat16)],     # normalized tile
        ),
        compiler_params=pltpu.CompilerParams(
            # Row tiles independent -> "parallel" (v7x megacore). The H axis
            # reuses the per-row-tile normalized scratch -> "arbitrary".
            dimension_semantics=("parallel", "arbitrary"),
        ),
    )(x2, w_bf, b_fold)

    if rows_p != rows:
        out2 = out2[:rows]
    if H_p != H:
        out2 = out2[:, :H]
    return out2.reshape(B, S, H)


def prenorm_fn_reference(x, gamma, beta, w, b):
    """Pure-JAX reference (f32 throughout) matching PyTorch PreNorm + Linear."""
    xf = x.astype(jnp.float32)
    mean = jnp.mean(xf, axis=-1, keepdims=True)
    var = jnp.mean((xf - mean) ** 2, axis=-1, keepdims=True)
    y = (xf - mean) * jax.lax.rsqrt(var + EPS) * gamma[0] + beta[0]
    return (y @ w.astype(jnp.float32) + b[0]).astype(x.dtype)


if __name__ == "__main__":
    key = jax.random.PRNGKey(0)
    # Small MobileViT-style transformer-block shapes: 2 x 128 tokens, dim 64, hidden 128.
    B, S, D, H = 2, 128, 64, 128

    kx, kw, kg, kb = jax.random.split(key, 4)
    x = jax.random.normal(kx, (B, S, D), dtype=jnp.float32)

    # Non-trivial affine so the gamma/beta -> W'/b' folding is actually exercised.
    gamma = (1.0 + 0.1 * jax.random.normal(kg, (1, D))).astype(jnp.float32)
    beta = (0.1 * jax.random.normal(kb, (1, D))).astype(jnp.float32)
    # fn = Linear(D, H): deterministic synthetic weights, (D, H) layout.
    w = (jax.random.normal(kw, (D, H)) * 0.02).astype(jnp.float32)
    b = jnp.zeros((1, H), dtype=jnp.float32)

    out = prenorm_fn(x, gamma, beta, w, b)
    out = jax.block_until_ready(out)

    ref = prenorm_fn_reference(x, gamma, beta, w, b)
    assert out.shape == (B, S, H)
    # bf16 MXU operands (f32 accumulation) vs. the pure-f32 reference.
    err = float(jnp.max(jnp.abs(out - ref)))
    assert jnp.allclose(out, ref, atol=1e-2, rtol=1e-2), f"max abs err = {err}"

    print("KERNEL_OK")
</pallas_src>

<mosaic_0001>
module attributes {stable_mosaic.version = 11 : i64} {
  func.func @_prenorm_linear_kernel(%arg0: i32, %arg1: i32, %arg2: memref<32x64xf32, #tpu.memory_space<vmem>>, %arg3: memref<64x128xbf16, #tpu.memory_space<vmem>>, %arg4: memref<1x128xf32, #tpu.memory_space<vmem>>, %arg5: memref<32x128xf32, #tpu.memory_space<vmem>>, %arg6: memref<32x64xbf16, #tpu.memory_space<vmem>>) attributes {dimension_semantics = [#tpu.dimension_semantics<parallel>, #tpu.dimension_semantics<arbitrary>], iteration_bounds = array<i64: 8, 1>, scalar_prefetch = 0 : i64, scratch_operands = 1 : i64, tpu.core_type = #tpu.core_type<tc>, window_params = [{transform_indices = @transform_0, window_bounds = array<i64: 32, 64>}, {transform_indices = @transform_1, window_bounds = array<i64: 64, 128>}, {transform_indices = @transform_2, window_bounds = array<i64: 1, 128>}, {transform_indices = @transform_3, window_bounds = array<i64: 32, 128>}]} {
    %c0_i32 = arith.constant 0 : i32
    %0 = arith.cmpi eq, %arg1, %c0_i32 : i32
    %1 = arith.extui %0 : i1 to i32
    %c0_i32_0 = arith.constant 0 : i32
    %2 = arith.cmpi ne, %1, %c0_i32_0 : i32
    scf.if %2 {
      %c0_8 = arith.constant 0 : index
      %c0_9 = arith.constant 0 : index
      %10 = vector.load %arg2[%c0_8, %c0_9] : memref<32x64xf32, #tpu.memory_space<vmem>>, vector<32x64xf32>
      %cst_10 = arith.constant dense<0.000000e+00> : vector<32xf32>
      %11 = vector.multi_reduction <add>, %10, %cst_10 [1] : vector<32x64xf32> to vector<32xf32>
      %12 = vector.shape_cast %11 : vector<32xf32> to vector<32x1xf32>
      %cst_11 = arith.constant 1.562500e-02 : f32
      %13 = vector.broadcast %cst_11 : f32 to vector<32x1xf32>
      %14 = arith.mulf %12, %13 : vector<32x1xf32>
      %15 = vector.broadcast %14 : vector<32x1xf32> to vector<32x64xf32>
      %16 = arith.subf %10, %15 : vector<32x64xf32>
      %17 = arith.mulf %16, %16 : vector<32x64xf32>
      %cst_12 = arith.constant dense<0.000000e+00> : vector<32xf32>
      %18 = vector.multi_reduction <add>, %17, %cst_12 [1] : vector<32x64xf32> to vector<32xf32>
      %19 = vector.shape_cast %18 : vector<32xf32> to vector<32x1xf32>
      %cst_13 = arith.constant 1.562500e-02 : f32
      %20 = vector.broadcast %cst_13 : f32 to vector<32x1xf32>
      %21 = arith.mulf %19, %20 : vector<32x1xf32>
      %cst_14 = arith.constant 9.99999974E-6 : f32
      %22 = vector.broadcast %cst_14 : f32 to vector<32x1xf32>
      %23 = arith.addf %21, %22 : vector<32x1xf32>
      %24 = math.rsqrt %23 : vector<32x1xf32>
      %25 = vector.broadcast %24 : vector<32x1xf32> to vector<32x64xf32>
      %26 = arith.mulf %16, %25 : vector<32x64xf32>
      %27 = arith.truncf %26 : vector<32x64xf32> to vector<32x64xbf16>
      %c0_15 = arith.constant 0 : index
      %c0_16 = arith.constant 0 : index
      %28 = vector.load %arg6[%c0_15, %c0_16] : memref<32x64xbf16, #tpu.memory_space<vmem>>, vector<32x64xbf16>
      tpu.vector_store %arg6[%c0_15, %c0_16], %27 {strides = array<i32>} : memref<32x64xbf16, #tpu.memory_space<vmem>>, vector<32x64xbf16>,
    } else {
    }
    %c0 = arith.constant 0 : index
    %c0_1 = arith.constant 0 : index
    %3 = vector.load %arg6[%c0, %c0_1] : memref<32x64xbf16, #tpu.memory_space<vmem>>, vector<32x64xbf16>
    %c0_2 = arith.constant 0 : index
    %c0_3 = arith.constant 0 : index
    %4 = vector.load %arg3[%c0_2, %c0_3] : memref<64x128xbf16, #tpu.memory_space<vmem>>, vector<64x128xbf16>
    %cst = arith.constant dense<0.000000e+00> : vector<32x128xf32>
    %5 = tpu.matmul %3, %4, %cst {dimension_numbers = #tpu.dot_dimension_numbers<[1], [0], [0], [1], [0, 0, 1, 1], [], []>} : vector<32x64xbf16>, vector<64x128xbf16>, vector<32x128xf32> -> vector<32x128xf32>
    %c0_4 = arith.constant 0 : index
    %c0_5 = arith.constant 0 : index
    %6 = vector.load %arg4[%c0_4, %c0_5] : memref<1x128xf32, #tpu.memory_space<vmem>>, vector<1x128xf32>
    %7 = vector.broadcast %6 : vector<1x128xf32> to vector<32x128xf32>
    %8 = arith.addf %5, %7 : vector<32x128xf32>
    %c0_6 = arith.constant 0 : index
    %c0_7 = arith.constant 0 : index
    %9 = vector.load %arg5[%c0_6, %c0_7] : memref<32x128xf32, #tpu.memory_space<vmem>>, vector<32x128xf32>
    tpu.vector_store %arg5[%c0_6, %c0_7], %8 {strides = array<i32>} : memref<32x128xf32, #tpu.memory_space<vmem>>, vector<32x128xf32>,
    return
  }
  func.func @transform_0(%arg0: i32, %arg1: i32) -> (i32, i32) {
    %c0_i32 = arith.constant 0 : i32
    %c0_i32_0 = arith.constant 0 : i32
    return %arg0, %c0_i32 : i32, i32
  }
  func.func @transform_1(%arg0: i32, %arg1: i32) -> (i32, i32) {
    %c0_i32 = arith.constant 0 : i32
    %c0_i32_0 = arith.constant 0 : i32
    return %c0_i32, %arg1 : i32, i32
  }
  func.func @transform_2(%arg0: i32, %arg1: i32) -> (i32, i32) {
    %c0_i32 = arith.constant 0 : i32
    %c0_i32_0 = arith.constant 0 : i32
    return %c0_i32, %arg1 : i32, i32
  }
  func.func @transform_3(%arg0: i32, %arg1: i32) -> (i32, i32) {
    %c0_i32 = arith.constant 0 : i32
    return %arg0, %arg1 : i32, i32
  }
}

</mosaic_0001>

<bundles_post_ra>
// kernel: tpu_custom_call.1
= control target key start
LH: loop header
LB: loop body
LE: loop exit
PB: predicated region body
PF: predicated region fallthrough
CT: control target
= control target key end

     0   :  { %8 = vsyncpa [#allocation4], 0  ;;  %s888_s0 = inlined_call_operand.vmem [shape: f32[256,64], index: 0, kind: input, shape index: {}]   ;;  %s889_s1 = inlined_call_operand.vmem [shape: bf16[64,128], index: 1, kind: input, shape index: {}]   ;;  %s890_s2 = inlined_call_operand.vmem [shape: f32[1,128], index: 2, kind: input, shape index: {}]   ;;  %s891_s3 = inlined_call_operand.hbm [shape: f32[256,128], index: 3, kind: output, shape index: {}]  }
   0x1   :  { %10 = vsyncpa [#allocation4 + $0x1], 0  ;;  %s750_s12 = smov 0   ;;  %s752_s13 = smov 0  }
   0x2   :  { %s754_s14 = smov 0   ;;  %s756_s15 = smov 0  }
   0x3   :  { %s758_s16 = smov 0   ;;  %s760_s17 = smov 0  }
   0x4 LB: > { %s527_s18 = sadd.s32 4294967295, %s725_s17   ;;  %s528_s19 = sadd.s32 4294967294, %s725_s17   ;;  %s725_s17 = sphi %s760_s17, %s16_s17   ;;  %s721_s16 = sphi %s758_s16, %s898_s16   ;;  %s717_s15 = sphi %s756_s15, %s897_s15   ;;  %s713_s14 = sphi %s754_s14, %s896_s14   ;;  %s709_s13 = sphi %s752_s13, %s895_s13   ;;  %s705_s12 = sphi %s750_s12, %s894_s12  }
   0x5   : > { %s28_s20 = sadd.s32 1, %s721_s16  ;;  %s115_s21 = sadd.s32 1, %s713_s14 }
   0x6   : > { %p30_p0 = scmp.ge.s32.totalorder %s28_s20, 8  ;;  %p125_p1 = scmp.ne.s32.totalorder %s713_s14, %s709_s13 }
   0x7   : > { %p126_p2 = scmp.eq.s32.totalorder %s527_s18, 7  ;;  %p131_p3 = scmp.ne.s32.totalorder %s709_s13, %s705_s12 }
   0x8   : > { %s900_s20 = smov (%p30_p0, %s28_s20), 0  ;;  %p132_p5 = scmp.eq.s32.totalorder %s528_s19, 7 }
   0x9   : > { %p790_p4 = por %p126_p2, %p125_p1  ;;  %s110_s23 = ssub.s32 %s721_s16, %s900_s20 }
   0xa   : > { %p533_p6 = scmp.ge.s32.totalorder %s725_s17, 1  ;;  %p113_p7 = scmp.eq.s32.totalorder %s110_s23, 0 }
   0xb   : > { %p797_p8 = por %p132_p5, %p131_p3  ;;  %p172_p9 = scmp.lt.s32.totalorder %s725_s17, 9 }
   0xc   : > { %s803_s25 = scalar_select %p113_p7, %s713_s14, %s115_s21  }
   0xd   : > { %p173_p10 = pnand %p533_p6, %p172_p9 }
   0xe   : > { %s535_s26 = sshll.u32 (!%p173_p10), %s717_s15, 2  ;;  %s200_s18 = sand.u32 (!%p173_p10), 1, %s709_s13  }
   0xf   : > { %176 = sbr.rel (%p173_p10) target bundleno = 561 (0x231), region = 32  ;;  %p204_p11 = scmp.lt.s32.totalorder (!%p173_p10), %s535_s26, 31 }
  0x10   : > { %s534_s19 = sshll.u32 (!%p173_p10), %s200_s18, 5  ;;  %s559_s28 = sshll.u32 (!%p173_p10), %s717_s15, 9 }
  0x11   : > { %s841_s4 = scalar_lea.hbm (!%p173_p10), %s891_s3, %s559_s28  ;;  %s843_s5 = scalar_lea.sflag (!%p173_p10), [#allocation4], %s200_s18 }
  0x12   : > { %s727_s15 = smov (!%p173_p10), [#allocation3]  }
  0x13   : > { %s653_s7 = sshll.u32 (!%p173_p10), %s727_s15, 4  ;;  %s654_s7 = int_to_ptr.vmem [resolvable:$false] %s653_s7 }
  0x14   : > { %s902_s26 = smov (!%p204_p11, %s535_s26), 31  ;;  %vm226_vm0 = vcmask 523264   ;;  %v635_v28 = vld [vmem:[%s889_s1 + $0x18] sm:$0xff]   ;;  %v636_v29 = vld [vmem:[%s889_s1 + $0x10] sm:$0xff]   ;;  %v637_v30 = vld [vmem:[%s889_s1 + $0x8] sm:$0xff]   ;;  %vm295_vm1 = vcmask 519168  }
  0x15   : > { %s536_s27 = sshll.u32 %s902_s26, 3  ;;  %566 = vmatprep.subr.bf16.mxu0 %v635_v28  ;;  %v638_v31 = vld [vmem:[%s889_s1] sm:$0xff]   ;;  %s202_s26 = scalar_lea.vmem [#allocation3], %s534_s19 }
  0x16   : > { %s207_s30 = scalar_lea.vmem %s888_s0, %s536_s27  ;;  %567 = vmatpush3.bf16.msra.mxu0 %v635_v28  ;;  %v541_v58 = vld [vmem:[%s890_s2] ss:$0 sm:$0xff]  ;;  %s428_s27 = sshll.u32 %s202_s26, 4  ;;  %s836_s27 = int_to_ptr.vmem [resolvable:$true] %s428_s27 }
  0x17   : > { %v222_v0 = vld [vmem:[%s207_s30] sm:$0xff]  ;;  %v224_v1 = vld [vmem:[%s207_s30 + $0x10] sm:$0xff]  ;;  %v223_v2 = vld [vmem:[%s207_s30 + $0x8] sm:$0xff]  ;;  %568 = vmatprep.subr.bf16.mxu0 %v636_v29  ;;  %s649_s6 = scalar_lea.vmem %s836_s27, 512  ;;  %s655_s8 = scalar_lea.vmem %s654_s7, 1024 }
  0x18   : > { %v227_v3 = vsel %vm226_vm0, %v222_v0, 0.0  ;;  %v233_v4 = vsel %vm226_vm0, %v224_v1, 0.0  ;;  %v225_v5 = vld [vmem:[%s207_s30 + $0x18] sm:$0xff]  ;;  %v230_v6 = vsel %vm226_vm0, %v223_v2, 0.0  ;;  %p650_p12 = scmp.ne.s32.totalorder %s836_s27, %s649_s6  ;;  %p656_p1 = scmp.lt.s32.totalorder %s836_s27, %s654_s7 }
  0x19   : > { %228 = vadd.xlane.f32.xlu0 %v227_v3  ;;  %234 = vadd.xlane.f32.xlu1 %v233_v4  ;;  %v236_v7 = vsel %vm226_vm0, %v225_v5, 0.0  ;;  %p657_p2 = scmp.lt.s32.totalorder %s655_s8, %s649_s6 }
  0x1a   : > { %569 = vmatpush3.bf16.msra.mxu0 %v636_v29  ;;  %p651_p13 = pnand %p650_p12, %p790_p4 }
  0x1b   : > { %570 = vmatprep.subr.bf16.mxu0 %v637_v30  ;;  %p658_p3 = por %p657_p2, %p656_p1 }
  0x1c   : > { %p652_p0 = pneg %p651_p13 }
  0x1d   : > { %231 = vadd.xlane.f32.xlu0 %v230_v6  ;;  %237 = vadd.xlane.f32.xlu1 %v236_v7 }
  0x1e   : > { %571 = vmatpush3.bf16.msra.mxu0 %v637_v30  ;;  %p659_p5 = pnand %p658_p3, %p652_p0 }
  0x1f   : > { %572 = vmatprep.subr.bf16.mxu0 %v638_v31 }
  0x22   : > { %573 = vmatpush3.bf16.msra.mxu0 %v638_v31 }
  0xa2   : > { %v229_v8 = vpop.xlane.xlu0 %228  ;;  %v235_v9 = vpop.xlane.xlu1 %234 }
  0xa3   : > { %v239_v10 = vmul.f32 0.015625, %v229_v8  ;;  %v241_v11 = vmul.f32 0.015625, %v235_v9 }
  0xa5   : > { %v243_v12 = vsub.f32 %v222_v0, %v239_v10  ;;  %v245_v13 = vsub.f32 %v224_v1, %v241_v11 }
  0xa6   : > { %v232_v14 = vpop.xlane.xlu0 %231  ;;  %v238_v15 = vpop.xlane.xlu1 %237 }
  0xa7   : > { %v240_v16 = vmul.f32 0.015625, %v232_v14  ;;  %v242_v17 = vmul.f32 0.015625, %v238_v15  ;;  %v247_v18 = vmul.f32 %v243_v12, %v243_v12  ;;  %v249_v19 = vmul.f32 %v245_v13, %v245_v13 }
  0xa9   : > { %v244_v20 = vsub.f32 %v223_v2, %v240_v16  ;;  %v246_v21 = vsub.f32 %v225_v5, %v242_v17  ;;  %v251_v22 = vsel %vm226_vm0, %v247_v18, 0.0  ;;  %v257_v23 = vsel %vm226_vm0, %v249_v19, 0.0 }
  0xaa   : > { %252 = vadd.xlane.f32.xlu0 %v251_v22 }
  0xab   : > { %v248_v24 = vmul.f32 %v244_v20, %v244_v20  ;;  %v250_v25 = vmul.f32 %v246_v21, %v246_v21 }
  0xad   : > { %v254_v26 = vsel %vm226_vm0, %v248_v24, 0.0  ;;  %v260_v27 = vsel %vm226_vm0, %v250_v25, 0.0 }
  0xae   : > { %258 = vadd.xlane.f32.xlu0 %v257_v23  ;;  %255 = vadd.xlane.f32.xlu1 %v254_v26 }
  0xb2   : > { %261 = vadd.xlane.f32.xlu1 %v260_v27 }
 0x133   : > { %v253_v32 = vpop.xlane.xlu0 %252 }
 0x134   : > { %v263_v33 = vmul.f32 0.015625, %v253_v32 }
 0x136   : > { %v267_v34 = vadd.f32 1e-05, %v263_v33 }
 0x137   : > { %v256_v35 = vpop.xlane.xlu1 %255  ;;  %v259_v36 = vpop.xlane.xlu0 %258 }
 0x138   : > { %641 = vrsqrt.f32 %v267_v34  ;;  %v264_v37 = vmul.f32 0.015625, %v256_v35  ;;  %v265_v38 = vmul.f32 0.015625, %v259_v36 }
 0x13a   : > { %v268_v39 = vadd.f32 1e-05, %v264_v37  ;;  %v269_v40 = vadd.f32 1e-05, %v265_v38 }
 0x13b   : > { %v262_v41 = vpop.xlane.xlu1 %261 }
 0x13c   : > { %643 = vrsqrt.f32 %v268_v39  ;;  %v266_v42 = vmul.f32 0.015625, %v262_v41 }
 0x13d   : > { %645 = vrsqrt.f32 %v269_v40 }
 0x13e   : > { %v270_v43 = vadd.f32 1e-05, %v266_v42 }
 0x140   : > { %647 = vrsqrt.f32 %v270_v43 }
 0x145   : > { %v642_v44 = vpop.eup %641 }
 0x146   : > { %v275_v45 = vmul.f32 %v642_v44, %v243_v12 }
 0x148   : > { %v555_v46 = vpack.c.bf16 %v275_v45, %v275_v45 }
 0x149   : > { %v644_v47 = vpop.eup %643 }
 0x14a   : > { %v646_v48 = vpop.eup %645  ;;  %296 = vst.msk [vmem:[#allocation2] sm:$0xf] %vm295_vm1, %v555_v46  ;;  %v276_v49 = vmul.f32 %v644_v47, %v244_v20 }
 0x14b   : > { %v277_v50 = vmul.f32 %v646_v48, %v245_v13 }
 0x14c   : > { %v556_v51 = vpack.c.bf16 %v276_v49, %v276_v49 }
 0x14d   : > { %v648_v52 = vpop.eup %647  ;;  %v557_v53 = vpack.c.bf16 %v277_v50, %v277_v50 }
 0x14e   : > { %297 = vst.msk [vmem:[#allocation2 + $0x4] sm:$0xf] %vm295_vm1, %v556_v51  ;;  %v278_v54 = vmul.f32 %v648_v52, %v246_v21 }
 0x14f   : > { %298 = vst.msk [vmem:[#allocation2 + $0x8] sm:$0xf] %vm295_vm1, %v557_v53 }
 0x150   : > { %v558_v55 = vpack.c.bf16 %v278_v54, %v278_v54 }
 0x152   : > { %299 = vst.msk [vmem:[#allocation2 + $0xc] sm:$0xf] %vm295_vm1, %v558_v55 }
 0x155   : > { %v639_v56 = vld [vmem:[#allocation2] sm:$0xff]  }
 0x156   : > { %574 = vmatprep.mubr.msk.bf16.mxu0 %vm226_vm0, %v639_v56 }
 0x159   : > { %v640_v57 = vld [vmem:[#allocation2 + $0x8] sm:$0xff]  }
 0x15a   : > { %575 = vmatmul.mubr.msk.bf16.vlgmr.msra.gmra.mxu0 %vm226_vm0, %v640_v57 }
 0x21a   : > { %v576_v59 = vpop.f32.mrf.mxu0 }
 0x21b   : > { %v403_v60 = vadd.f32 %v576_v59, %v541_v58 }
 0x21c   : > { %v394_v61 = vpop.f32.mrf.mxu0 }
 0x21d   : > { %411 = vst [vmem:[%s202_s26 + $0x10] sm:$0xff] %v403_v60  ;;  %v395_v62 = vadd.f32 %v541_v58, %v394_v61 }
 0x21e   : > { %v577_v63 = vpop.f32.mrf.mxu0 }
 0x21f   : > { %409 = vst [vmem:[%s202_s26] sm:$0xff] %v395_v62  ;;  %v406_v0 = vadd.f32 %v577_v63, %v541_v58 }
 0x220   : > { %v397_v1 = vpop.f32.mrf.mxu0 }
 0x221   : > { %412 = vst [vmem:[%s202_s26 + $0x18] sm:$0xff] %v406_v0  ;;  %v398_v2 = vadd.f32 %v541_v58, %v397_v1 }
 0x223   : > { %410 = vst [vmem:[%s202_s26 + $0x8] sm:$0xff] %v398_v2 }
 0x224   : > { %662 = shalt.err (!%p659_p5)
}
 0x225   : > { %s663_s9 = scalar_lea.hbm %s841_s4, 512  ;;  %s667_s18 = scalar_lea.hbm %s891_s3, 4096 }
 0x226   : > { %p664_p6 = scmp.ne.s32.totalorder %s841_s4, %s663_s9  ;;  %p668_p10 = scmp.lt.s32.totalorder %s841_s4, %s891_s3 }
 0x227   : > { %p669_p11 = scmp.lt.s32.totalorder %s667_s18, %s663_s9 }
 0x228   : > { %p665_p7 = pnand %p664_p6, %p790_p4 }
 0x229   : > { %p670_p12 = por %p669_p11, %p668_p10 }
 0x22a   : > { %p666_p9 = pneg %p665_p7 }
 0x22c   : > { %p671_p13 = pnand %p670_p12, %p666_p9 }
 0x22e   : > { %674 = shalt.err (!%p671_p13)
}
 0x22f   : > { %s728_s23 = smov 128   ;;  %s729_s26 = smov 8  }
 0x230   : > { %578 = dma.vmem_to_hbm [thread:$0]  (%p790_p4), %s836_s27, 512, %s841_s4, %s843_s5, %s728_s23, %s728_s23, %s729_s26  }
 0x231 PF: > { %p584_p0 = scmp.ge.s32.totalorder %s725_s17, 2  ;;  %s443_s28 = sand.u32 1, %s705_s12  }
 0x232   : > { %s444_s29 = scalar_lea.sflag [#allocation4], %s443_s28 }
 0x233   : > { %p581_p1 = pnand %p584_p0, %p797_p8 }
 0x235   : > { %p582_p2 = pneg %p581_p1 }
 0x237   : > { %700 = dma.done.wait (%p582_p2), %s444_s29, 512  }
 0x238   : > { %702 = vsyncadd (%p582_p2), %s444_s29, 4294966784  ;;  %s16_s17 = sadd.s32 1, %s725_s17   ;;  %s894_s12 = smov %s709_s13 }
 0x239   : > { %p13_p3 = scmp.ge.s32.totalorder %s16_s17, 10   ;;  %s895_s13 = smov %s713_s14 }
 0x23a   : > { %s896_s14 = smov %s803_s25  ;;  %s897_s15 = smov %s721_s16 }
 0x23b   : > { %s898_s16 = smov %s900_s20  ;;  %15 = sbr.rel (!%p13_p3) target bundleno = 4 (0x4), region = 77 }
 0x240   :  { %449 = vsyncpa [#allocation4], 1 }
 0x241   :  { %451 = vsyncpa [#allocation4 + $0x1], 1 }

</bundles_post_ra>
